<compile_context>
chip_gen: v7x
topology: tpu7x:2x2x1
jax: 0.10.0
libtpu: 0.0.40
codegen_flags: <defaults>
</compile_context>

<pallas_src>
import functools

import jax
import jax.numpy as jnp
from jax import lax
from jax.experimental import pallas as pl
from jax.experimental.pallas import tpu as pltpu


def _round_up(n, m):
    return ((n + m - 1) // m) * m


def _device_kind():
    try:
        return jax.devices()[0].device_kind.lower()
    except Exception:
        return ""


def _vmem_capacity_bytes():
    """Physical VMEM per TensorCore; conservative 64 MiB if undetectable."""
    try:
        cap = int(pltpu.get_tpu_info().vmem_capacity_bytes)
        if cap > 0:
            return cap
    except Exception:
        pass
    kind = _device_kind()
    if "v7" in kind:
        return 64 << 20
    if kind:
        return 128 << 20   # v5e / v5p / v6e
    return 64 << 20        # unknown: assume the smallest (v7x) to be safe


def _vmem_estimate(tile_rows, hidden_padded, itemsize):
    """Footprint with physical (sublane, lane) padding already applied."""
    io = 2 * 2 * tile_rows * hidden_padded * itemsize   # x + out, double buffered
    tmp = 4 * tile_rows * hidden_padded * 4             # f32 temporaries in the body
    params = 2 * 2 * 8 * hidden_padded * 4              # weight/bias blocks (padded)
    return io + tmp + params + (2 << 20)                # margin


def _pick_tile_rows(rows, hidden_padded, target_block_bytes, gran):
    """Large row tiles to amortize ~0.35us per grid step, but keep >=~4 steps."""
    t = target_block_bytes // max(hidden_padded * 4, 1)
    t = max(gran, min(t, 2048))
    t = (t // gran) * gran
    # Keep at least ~4 grid steps when rows allow so v7x's two TensorCores
    # both get work on the "parallel" axis.
    t = min(t, _round_up(pl.cdiv(rows, 4), gran))
    return max(t, gran)


def _layernorm_kernel(x_ref, w_ref, b_ref, o_ref, *, eps, hidden,
                      low_precision_epilogue):
    # Single sweep statistics (f32 accumulation).
    x = x_ref[...].astype(jnp.float32)                        # (tile_rows, H)
    s1 = jnp.sum(x, axis=-1, keepdims=True)                   # (tile_rows, 1)
    s2 = jnp.sum(x * x, axis=-1, keepdims=True)
    mu = s1 * jnp.float32(1.0 / hidden)
    # torch.std default is unbiased (ddof=1); hidden == 1 guarded (out == bias).
    inv_nm1 = jnp.float32(1.0 / max(hidden - 1, 1))
    # Clamp tiny negative values from cancellation in (s2 - s1*mu).
    var = jnp.maximum((s2 - s1 * mu) * inv_nm1, jnp.float32(0.0))
    # 1 / clamp(sqrt(var), eps) == min(rsqrt(var), 1/eps); rsqrt runs on the EUP.
    inv_sigma = jnp.minimum(lax.rsqrt(var), jnp.float32(1.0 / eps))

    w = w_ref[...].astype(jnp.float32)                        # (1, H)
    b = b_ref[...].astype(jnp.float32)                        # (1, H)
    if low_precision_epilogue:
        # v6e/v7x bf16 path: stats in f32, elementwise epilogue at input precision.
        cdt = o_ref.dtype
        o_ref[...] = ((x_ref[...] - mu.astype(cdt)) * (inv_sigma * w).astype(cdt)
                      + b_ref[...].astype(cdt))
    else:
        o_ref[...] = ((x - mu) * (inv_sigma * w) + b).astype(o_ref.dtype)


def layernorm_pallas(x, weight, bias, eps=1e-6, tile_rows=None):
    """x: (..., hidden); weight/bias: (hidden,). Normalizes over the last axis."""
    orig_shape = x.shape
    hidden = orig_shape[-1]
    rows = 1
    for d in orig_shape[:-1]:
        rows *= d
    x2 = x.reshape(rows, hidden)
    w2 = weight.reshape(1, hidden)
    b2 = bias.reshape(1, hidden)

    itemsize = jnp.dtype(x.dtype).itemsize
    # Sublane granularity: 8 for 32-bit, 16 for packed sub-32-bit dtypes (bf16).
    gran = 8 if itemsize >= 4 else 16
    hidden_padded = _round_up(hidden, 128)     # physical lane padding in VMEM

    vmem_cap = _vmem_capacity_bytes()
    vmem_budget = (vmem_cap * 3) // 4          # ~48 MiB on v7x, ~96 MiB on v5e/v6e
    target_block_bytes = (4 << 20) if vmem_cap <= (64 << 20) else (8 << 20)

    if tile_rows is None:
        tile_rows = _pick_tile_rows(rows, hidden_padded, target_block_bytes, gran)
    # Shrink the tile if the layout-padded footprint would blow the budget.
    while (_vmem_estimate(tile_rows, hidden_padded, itemsize) > vmem_budget
           and tile_rows > gran):
        tile_rows = max(gran, (tile_rows // 2 // gran) * gran)

    vmem_limit = int(min(vmem_budget,
                         max(_vmem_estimate(tile_rows, hidden_padded, itemsize),
                             32 << 20)))

    # No wrapper pad/slice: Pallas masks the ragged last block (rows independent,
    # out-of-bounds output rows are dropped; garbage read rows never leak out).
    grid = (pl.cdiv(rows, tile_rows),)

    low_precision_epilogue = (jnp.dtype(x.dtype) == jnp.bfloat16
                              and "v5" not in _device_kind())

    kernel = functools.partial(_layernorm_kernel, eps=eps, hidden=hidden,
                               low_precision_epilogue=low_precision_epilogue)

    out = pl.pallas_call(
        kernel,
        out_shape=jax.ShapeDtypeStruct((rows, hidden), x.dtype),
        grid_spec=pltpu.PrefetchScalarGridSpec(
            num_scalar_prefetch=0,
            grid=grid,
            in_specs=[
                pl.BlockSpec((tile_rows, hidden), lambda i: (i, 0)),
                pl.BlockSpec((1, hidden), lambda i: (0, 0)),
                pl.BlockSpec((1, hidden), lambda i: (0, 0)),
            ],
            out_specs=pl.BlockSpec((tile_rows, hidden), lambda i: (i, 0)),
        ),
        compiler_params=pltpu.CompilerParams(
            dimension_semantics=("parallel",),   # lets v7x shard across 2 TCs
            vmem_limit_bytes=vmem_limit,
        ),
    )(x2, w2, b2)

    return out.reshape(orig_shape)


def layernorm_ref(x, weight, bias, eps=1e-6):
    mu = jnp.mean(x, axis=-1, keepdims=True)
    var = jnp.var(x, axis=-1, keepdims=True, ddof=1)
    sigma = jnp.maximum(jnp.sqrt(var), eps)
    return (x - mu) / sigma * weight + bias


if __name__ == "__main__":
    key = jax.random.PRNGKey(0)
    hidden = 32
    # Matches nn.Parameter(torch.ones(hidden)) / nn.Parameter(torch.zeros(hidden)).
    weight = jnp.ones((hidden,), dtype=jnp.float32)
    bias = jnp.zeros((hidden,), dtype=jnp.float32)

    # Primary case: batch=2, seq=8, hidden=32 (rows divisible by the row tile).
    k1, k2 = jax.random.split(key)
    x = jax.random.normal(k1, (2, 8, hidden), dtype=jnp.float32)
    out = jax.block_until_ready(layernorm_pallas(x, weight, bias, eps=1e-6))
    ref = layernorm_ref(x, weight, bias, eps=1e-6)
    assert out.shape == x.shape and out.dtype == x.dtype
    assert jnp.allclose(out, ref, atol=5e-5, rtol=5e-5), "mismatch vs reference"

    # Ragged case: rows (= 3*7 = 21) not divisible by the row tile; exercises the
    # masked last block instead of a wrapper-side pad + slice.
    x_r = jax.random.normal(k2, (3, 7, hidden), dtype=jnp.float32)
    out_r = jax.block_until_ready(layernorm_pallas(x_r, weight, bias, eps=1e-6))
    ref_r = layernorm_ref(x_r, weight, bias, eps=1e-6)
    assert out_r.shape == x_r.shape and out_r.dtype == x_r.dtype
    assert jnp.allclose(out_r, ref_r, atol=5e-5, rtol=5e-5), "ragged mismatch"

    print("KERNEL_OK")
</pallas_src>

<mosaic_0001>
module attributes {stable_mosaic.version = 11 : i64} {
  func.func @_layernorm_kernel(%arg0: i32, %arg1: memref<8x32xf32, #tpu.memory_space<vmem>>, %arg2: memref<1x32xf32, #tpu.memory_space<vmem>>, %arg3: memref<1x32xf32, #tpu.memory_space<vmem>>, %arg4: memref<8x32xf32, #tpu.memory_space<vmem>>) attributes {dimension_semantics = [#tpu.dimension_semantics<parallel>], iteration_bounds = array<i64: 2>, scalar_prefetch = 0 : i64, scratch_operands = 0 : i64, tpu.core_type = #tpu.core_type<tc>, window_params = [{transform_indices = @transform_0, window_bounds = array<i64: 8, 32>}, {pipeline_mode = #tpu.pipeline_mode<synchronous>, transform_indices = @transform_1, window_bounds = array<i64: 1, 32>}, {pipeline_mode = #tpu.pipeline_mode<synchronous>, transform_indices = @transform_2, window_bounds = array<i64: 1, 32>}, {transform_indices = @transform_3, window_bounds = array<i64: 8, 32>}]} {
    %c0 = arith.constant 0 : index
    %c0_0 = arith.constant 0 : index
    %0 = vector.load %arg1[%c0, %c0_0] : memref<8x32xf32, #tpu.memory_space<vmem>>, vector<8x32xf32>
    %cst = arith.constant dense<0.000000e+00> : vector<8xf32>
    %1 = vector.multi_reduction <add>, %0, %cst [1] : vector<8x32xf32> to vector<8xf32>
    %2 = vector.shape_cast %1 : vector<8xf32> to vector<8x1xf32>
    %3 = arith.mulf %0, %0 : vector<8x32xf32>
    %cst_1 = arith.constant dense<0.000000e+00> : vector<8xf32>
    %4 = vector.multi_reduction <add>, %3, %cst_1 [1] : vector<8x32xf32> to vector<8xf32>
    %5 = vector.shape_cast %4 : vector<8xf32> to vector<8x1xf32>
    %cst_2 = arith.constant 3.125000e-02 : f32
    %6 = vector.broadcast %cst_2 : f32 to vector<8x1xf32>
    %7 = arith.mulf %2, %6 : vector<8x1xf32>
    %8 = arith.mulf %2, %7 : vector<8x1xf32>
    %9 = arith.subf %5, %8 : vector<8x1xf32>
    %cst_3 = arith.constant 0.0322580636 : f32
    %10 = vector.broadcast %cst_3 : f32 to vector<8x1xf32>
    %11 = arith.mulf %9, %10 : vector<8x1xf32>
    %cst_4 = arith.constant 0.000000e+00 : f32
    %12 = vector.broadcast %cst_4 : f32 to vector<8x1xf32>
    %13 = arith.maximumf %11, %12 : vector<8x1xf32>
    %14 = math.rsqrt %13 : vector<8x1xf32>
    %cst_5 = arith.constant 1.000000e+06 : f32
    %15 = vector.broadcast %cst_5 : f32 to vector<8x1xf32>
    %16 = arith.minimumf %14, %15 : vector<8x1xf32>
    %c0_6 = arith.constant 0 : index
    %c0_7 = arith.constant 0 : index
    %17 = vector.load %arg2[%c0_6, %c0_7] : memref<1x32xf32, #tpu.memory_space<vmem>>, vector<1x32xf32>
    %c0_8 = arith.constant 0 : index
    %c0_9 = arith.constant 0 : index
    %18 = vector.load %arg3[%c0_8, %c0_9] : memref<1x32xf32, #tpu.memory_space<vmem>>, vector<1x32xf32>
    %19 = vector.broadcast %7 : vector<8x1xf32> to vector<8x32xf32>
    %20 = arith.subf %0, %19 : vector<8x32xf32>
    %21 = vector.broadcast %16 : vector<8x1xf32> to vector<8x32xf32>
    %22 = vector.broadcast %17 : vector<1x32xf32> to vector<8x32xf32>
    %23 = arith.mulf %21, %22 : vector<8x32xf32>
    %24 = arith.mulf %20, %23 : vector<8x32xf32>
    %25 = vector.broadcast %18 : vector<1x32xf32> to vector<8x32xf32>
    %26 = arith.addf %24, %25 : vector<8x32xf32>
    %c0_10 = arith.constant 0 : index
    %c0_11 = arith.constant 0 : index
    %27 = vector.load %arg4[%c0_10, %c0_11] : memref<8x32xf32, #tpu.memory_space<vmem>>, vector<8x32xf32>
    tpu.vector_store %arg4[%c0_10, %c0_11], %26 {strides = array<i32>} : memref<8x32xf32, #tpu.memory_space<vmem>>, vector<8x32xf32>,
    return
  }
  func.func @transform_0(%arg0: i32) -> (i32, i32) {
    %c0_i32 = arith.constant 0 : i32
    %c0_i32_0 = arith.constant 0 : i32
    return %arg0, %c0_i32 : i32, i32
  }
  func.func @transform_1(%arg0: i32) -> (i32, i32) {
    %c0_i32 = arith.constant 0 : i32
    %c0_i32_0 = arith.constant 0 : i32
    %c0_i32_1 = arith.constant 0 : i32
    return %c0_i32, %c0_i32_0 : i32, i32
  }
  func.func @transform_2(%arg0: i32) -> (i32, i32) {
    %c0_i32 = arith.constant 0 : i32
    %c0_i32_0 = arith.constant 0 : i32
    %c0_i32_1 = arith.constant 0 : i32
    return %c0_i32, %c0_i32_0 : i32, i32
  }
  func.func @transform_3(%arg0: i32) -> (i32, i32) {
    %c0_i32 = arith.constant 0 : i32
    %c0_i32_0 = arith.constant 0 : i32
    return %arg0, %c0_i32 : i32, i32
  }
}

</mosaic_0001>

<bundles_post_ra>
// kernel: tpu_custom_call.1
= control target key start
LH: loop header
LB: loop body
LE: loop exit
PB: predicated region body
PF: predicated region fallthrough
CT: control target
= control target key end

     0   :  { %8 = vsyncpa [#allocation3], 0  ;;  %s657_s0 = inlined_call_operand.hbm [shape: f32[16,32], index: 0, kind: input, shape index: {}]   ;;  %s658_s1 = inlined_call_operand.vmem [shape: f32[1,32], index: 1, kind: input, shape index: {}]   ;;  %s659_s2 = inlined_call_operand.vmem [shape: f32[1,32], index: 2, kind: input, shape index: {}]   ;;  %s660_s3 = inlined_call_operand.hbm [shape: f32[16,32], index: 3, kind: output, shape index: {}]  }
   0x1   :  { %10 = vsyncpa [#allocation3 + $0x1], 0 }
   0x2   :  { %11 = vsyncpa [#allocation4], 0 }
   0x3   :  { %13 = vsyncpa [#allocation4 + $0x1], 0  ;;  %s487_s12 = smov 0   ;;  %s489_s13 = smov 0  }
   0x4   :  { %s491_s14 = smov 0   ;;  %s493_s15 = smov 0  }
   0x5 LB: > { %s508_s16 = sadd.s32 4294967295, %s463_s15   ;;  %s305_s17 = sadd.s32 4294967294, %s463_s15   ;;  %s463_s15 = sphi %s493_s15, %s675_s15   ;;  %s459_s14 = sphi %s491_s14, %s674_s14   ;;  %s455_s13 = sphi %s489_s13, %s673_s13   ;;  %s451_s12 = sphi %s487_s12, %s672_s12  }
   0x6   : > { %s512_s18 = sadd.s32 1, %s463_s15   ;;  %s26_s19 = sadd.s32 1, %s459_s14 }
   0x7   : > { %s23_s20 = ssub.s32 %s463_s15, %s512_s18  ;;  %p33_p0 = scmp.ne.s32.totalorder %s459_s14, %s455_s13 }
   0x8   : > { %p24_p1 = scmp.eq.s32.totalorder %s23_s20, 0  ;;  %p34_p2 = scmp.eq.s32.totalorder %s463_s15, 0 }
   0x9   : > { %p39_p3 = scmp.ne.s32.totalorder %s455_s13, %s451_s12  ;;  %p40_p4 = scmp.eq.s32.totalorder %s508_s16, 0 }
   0xa   : > { %s524_s21 = scalar_select %p24_p1, %s459_s14, %s26_s19  }
   0xb   : > { %p526_p5 = por %p34_p2, %p33_p0  ;;  %p530_p6 = por %p40_p4, %p39_p3 }
   0xc   : > { %p105_p7 = scmp.eq.s32.totalorder %s508_s16, 1  ;;  %p111_p8 = scmp.eq.s32.totalorder %s305_s17, 1 }
   0xd   : > { %p331_p10 = scmp.lt.s32.totalorder %s463_s15, 2  ;;  %s137_s26 = sand.u32 1, %s459_s14  }
   0xe   : > { %p537_p11 = por %p105_p7, %p33_p0  ;;  %p541_p12 = por %p111_p8, %p39_p3 }
   0xf   : > { %s309_s27 = sshll.u32 %s463_s15, 7  ;;  %s308_s28 = sshll.u32 %s137_s26, 3 }
  0x10   : > { %s664_s24 = scalar_select %p537_p11, 1, 0 }
  0x11   : > { %s665_s25 = scalar_select %p541_p12, 1, 0 }
  0x12   : > { %s550_s4 = scalar_lea.hbm %s657_s0, %s309_s27  ;;  %s141_s5 = scalar_lea.vmem [#allocation2], %s308_s28 }
  0x13   : > { %s148_s6 = sshll.u32 %s141_s5, 4  ;;  %p554_p13 = pnand %p331_p10, %p526_p5  ;;  %s558_s6 = int_to_ptr.vmem [resolvable:$true] %s148_s6 }
  0x14   : > { %s138_s8 = scalar_lea.sflag [#allocation3], %s137_s26  ;;  %s367_s9 = scalar_lea.hbm %s550_s4, 128 }
  0x15   : > { %p368_p2 = scmp.ne.s32.totalorder %s550_s4, %s367_s9  ;;  %p369_p3 = pneg %p554_p13 }
  0x16   : > { %s372_s17 = scalar_lea.hbm %s657_s0, 256  ;;  %p373_p5 = scmp.lt.u32.totalorder %s550_s4, %s657_s0 }
  0x17   : > { %p370_p4 = pnand %p369_p3, %p368_p2  ;;  %p374_p8 = scmp.lt.u32.totalorder %s372_s17, %s367_s9 }
  0x18   : > { %p376_p9 = scmp.lt.u32.totalorder %s367_s9, %s550_s4 }
  0x19   : > { %p371_p7 = pneg %p370_p4  ;;  %p375_p10 = por %p374_p8, %p373_p5 }
  0x1b   : > { %p377_p0 = por %p376_p9, %p375_p10 }
  0x1d   : > { %p378_p1 = pnand %p377_p0, %p371_p7 }
  0x1f   : > { %381 = shalt.err (!%p378_p1)
}
  0x20   : > { %s382_s22 = scalar_lea.vmem %s558_s6, 128  ;;  %s465_s26 = smov [#allocation2]  }
  0x21   : > { %p383_p2 = scmp.ne.s32.totalorder %s558_s6, %s382_s22  ;;  %s387_s27 = sshll.u32 %s465_s26, 4  ;;  %s388_s27 = int_to_ptr.vmem [resolvable:$false] %s387_s27 }
  0x22   : > { %s389_s28 = scalar_lea.vmem %s388_s27, 256  ;;  %p390_p11 = scmp.lt.s32.totalorder %s558_s6, %s388_s27 }
  0x23   : > { %p385_p4 = pnand %p383_p2, %p369_p3  ;;  %p391_p5 = scmp.lt.s32.totalorder %s389_s28, %s382_s22 }
  0x25   : > { %p386_p12 = pneg %p385_p4  ;;  %p392_p8 = por %p391_p5, %p390_p11 }
  0x27   : > { %p393_p9 = pnand %p392_p8, %p386_p12 }
  0x29   : > { %396 = shalt.err (!%p393_p9)
}
  0x2a   : > { %326 = dma.hbm_to_vmem [thread:$0]  (!%p554_p13), %s550_s4, 128, %s558_s6, %s138_s8  }
  0x2b   : > { %p667_p0 = scmp.lt.s32.totalorder %s463_s15, 3  ;;  %p668_p1 = scmp.ge.s32.totalorder %s463_s15, 1 }
  0x2d   : > { %p154_p3 = pnand %p668_p1, %p667_p0 }
  0x2e   : > { %s592_s29 = sand.u32 (!%p154_p3), 1, %s455_s13  }
  0x2f   : > { %157 = sbr.rel (%p154_p3) target bundleno = 242 (0xf2), region = 32  ;;  %s311_s30 = sshll.u32 (!%p154_p3), %s592_s29, 3 }
  0x30   : > { %s160_s5 = scalar_lea.sflag (!%p154_p3), [#allocation3], %s592_s29  ;;  %s163_s9 = scalar_lea.vmem (!%p154_p3), [#allocation2], %s311_s30 }
  0x36   : > { %442 = dma.done.wait (%p530_p6), %s160_s5, 128  }
  0x37   : > { %444 = vsyncadd (%p530_p6), %s160_s5, 4294967168  ;;  %vm187_vm0 = vcmask 261120   ;;  %v186_v0 = vld [vmem:[%s163_s9] sm:$0xff]  ;;  %s316_s8 = sshll.u32 %s508_s16, 7  ;;  %s185_s10 = scalar_lea.vmem [#allocation5], %s311_s30 }
  0x38   : > { %v188_v1 = vsel %vm187_vm0, %v186_v0, 0.0  ;;  %v191_v2 = vmul.f32 %v186_v0, %v186_v0  ;;  %v313_v12 = vld [vmem:[%s658_s1] ss:$0 sm:$0xff]  ;;  %s235_s11 = sshll.u32 %s185_s10, 4  ;;  %s612_s20 = scalar_lea.hbm %s660_s3, %s316_s8  ;;  %s614_s11 = int_to_ptr.vmem [resolvable:$true] %s235_s11 }
  0x39   : > { %189 = vadd.xlane.f32.xlu0 %v188_v1  ;;  %v314_v16 = vld [vmem:[%s659_s2] ss:$0 sm:$0xff]  ;;  %s222_s22 = scalar_lea.sflag [#allocation4], %s592_s29  ;;  %s397_s26 = scalar_lea.vmem %s614_s11, 128 }
  0x3a   : > { %v192_v3 = vsel %vm187_vm0, %v191_v2, 0.0  ;;  %p398_p6 = scmp.ne.s32.totalorder %s614_s11, %s397_s26  ;;  %p669_p11 = scmp.ne.s32.totalorder %s664_s24, 0 }
  0x3b   : > { %s466_s16 = smov [#allocation5]  }
  0x3c   : > { %p399_p12 = pnand %p398_p6, %p669_p11  ;;  %s401_s27 = sshll.u32 %s466_s16, 4  ;;  %s402_s27 = int_to_ptr.vmem [resolvable:$false] %s401_s27 }
  0x3d   : > { %193 = vadd.xlane.f32.xlu0 %v192_v3  ;;  %s403_s28 = scalar_lea.vmem %s402_s27, 256  ;;  %p404_p7 = scmp.lt.s32.totalorder %s614_s11, %s402_s27 }
  0x3e   : > { %p400_p13 = pneg %p399_p12  ;;  %p405_p10 = scmp.lt.s32.totalorder %s403_s28, %s397_s26 }
  0x40   : > { %p406_p2 = por %p405_p10, %p404_p7 }
  0x42   : > { %p407_p4 = pnand %p406_p2, %p400_p13 }
  0xc6   : > { %v190_v4 = vpop.xlane.xlu0 %189 }
  0xc7   : > { %v195_v5 = vmul.f32 0.03125, %v190_v4 }
  0xc9   : > { %v196_v6 = vmul.f32 %v195_v5, %v190_v4  ;;  %v204_v14 = vsub.f32 %v186_v0, %v195_v5 }
  0xca   : > { %v194_v7 = vpop.xlane.xlu0 %193 }
  0xcb   : > { %v197_v8 = vsub.f32 %v194_v7, %v196_v6 }
  0xcd   : > { %v198_v9 = vmul.f32 0.032258064, %v197_v8 }
  0xcf   : > { %v199_v10 = vmax.f32 %v198_v9, 0.0 }
  0xd1   : > { %365 = vrsqrt.f32 %v199_v10 }
  0xdb   : > { %v366_v11 = vpop.eup %365 }
  0xdc   : > { %v201_v13 = vmin.f32 %v366_v11, 1000000.0 }
  0xde   : > { %v211_v15 = vmul.f32 %v313_v12, %v201_v13 }
  0xe0   : > { %v212_v17 = vmul.f32 %v211_v15, %v204_v14 }
  0xe2   : > { %v219_v18 = vadd.f32 %v314_v16, %v212_v17 }
  0xe4   : > { %220 = vst.msk [vmem:[%s185_s10] sm:$0xff] %vm187_vm0, %v219_v18 }
  0xe5   : > { %410 = shalt.err (!%p407_p4)
}
  0xe6   : > { %s411_s29 = scalar_lea.hbm %s612_s20, 128  ;;  %s415_s9 = scalar_lea.hbm %s660_s3, 256 }
  0xe7   : > { %p412_p5 = scmp.ne.s32.totalorder %s612_s20, %s411_s29  ;;  %p416_p0 = scmp.lt.u32.totalorder %s612_s20, %s660_s3 }
  0xe8   : > { %p417_p1 = scmp.lt.u32.totalorder %s415_s9, %s411_s29  ;;  %p419_p6 = scmp.lt.u32.totalorder %s411_s29, %s612_s20 }
  0xe9   : > { %p413_p8 = pnand %p412_p5, %p669_p11 }
  0xea   : > { %p418_p3 = por %p417_p1, %p416_p0 }
  0xeb   : > { %p414_p9 = pneg %p413_p8 }
  0xec   : > { %p420_p12 = por %p419_p6, %p418_p3 }
  0xee   : > { %p421_p13 = pnand %p420_p12, %p414_p9 }
  0xf0   : > { %424 = shalt.err (!%p421_p13)
}
  0xf1   : > { %321 = dma.vmem_to_hbm [thread:$0]  (%p669_p11), %s614_s11, 128, %s612_s20, %s222_s22  }
  0xf2 PF: > { %s247_s6 = sand.u32 1, %s451_s12   ;;  %p670_p7 = scmp.ne.s32.totalorder %s665_s25, 0 }
  0xf3   : > { %p671_p10 = scmp.ge.s32.totalorder %s463_s15, 2  ;;  %s248_s7 = scalar_lea.sflag [#allocation4], %s247_s6 }
  0xf5   : > { %p328_p2 = pnand %p671_p10, %p670_p7 }
  0xf7   : > { %446 = dma.done.wait (!%p328_p2), %s248_s7, 128  }
  0xf8   : > { %448 = vsyncadd (!%p328_p2), %s248_s7, 4294967168  ;;  %p16_p4 = scmp.ge.s32.totalorder %s512_s18, 4   ;;  %s672_s12 = smov %s455_s13 }
  0xf9   : > { %s673_s13 = smov %s459_s14  ;;  %s674_s14 = smov %s524_s21 }
  0xfa   : > { %s675_s15 = smov %s512_s18  ;;  %18 = sbr.rel (!%p16_p4) target bundleno = 5 (0x5), region = 77 }
 0x101   :  { %253 = vsyncpa [#allocation3], 1 }
 0x102   :  { %255 = vsyncpa [#allocation3 + $0x1], 1 }
 0x103   :  { %256 = vsyncpa [#allocation4], 1 }
 0x104   :  { %258 = vsyncpa [#allocation4 + $0x1], 1 }

</bundles_post_ra>
